<compile_context>
chip_gen: v6e
topology: v6e:2x2x1
jax: 0.10.0
libtpu: 0.0.40
codegen_flags: <defaults>
</compile_context>

<pallas_src>
import jax
import jax.numpy as jnp
from jax import lax
from jax.experimental import pallas as pl
from jax.experimental.pallas import tpu as pltpu


# ----------------------------------------------------------------------------
# Fused multi-layer GRU kernel (one grid step == one GRU layer)
# ----------------------------------------------------------------------------
def _gru4rec_kernel(x_ref, wih_ref, whh_ref, o_ref, gx_ref):
    """x_ref:   (L, B, H)  time-major input embeddings (read at layer 0 only).
    wih_ref:   (1, H, 3H)  this layer's weight_ih (PyTorch (3H, H) transposed,
                            gate blocks [r | z | n] along the lane axis).
    whh_ref:   (1, H, 3H)  this layer's weight_hh, same layout.
    o_ref:     (L, B, H)   resident sequence buffer / final output (same block
                            index for every grid step -> stays in VMEM).
    gx_ref:    (L, B, 3H)  f32 scratch: whole-sequence input-gate pre-acts."""
    L, B, H = x_ref.shape
    layer = pl.program_id(0)

    # emb_dropout: nn.Dropout is identity in inference mode.
    # TODO(synk): training-mode stochastic dropout (pltpu PRNG) not implemented.
    @pl.when(layer == 0)
    def _():
        o_ref[...] = x_ref[...].astype(jnp.float32)

    w_ih = wih_ref[0].astype(jnp.float32)          # (H, 3H)
    w_hh = whh_ref[0].astype(jnp.float32)          # (H, 3H)

    # Input contribution for the whole sequence in one MXU matmul:
    # (L*B, H) @ (H, 3H) -> (L*B, 3H), gate blocks [r | z | n].
    seq2d = o_ref[...].reshape(L * B, H)
    gx_ref[...] = jnp.dot(
        seq2d, w_ih, preferred_element_type=jnp.float32).reshape(L, B, 3 * H)

    # The time recurrence is inherently sequential; everything here is
    # VMEM/vreg resident (contiguous (B, *) tile loads/stores per step).
    def step(t, h):
        gx = gx_ref[t]                                               # (B, 3H)
        gh = jnp.dot(h, w_hh, preferred_element_type=jnp.float32)    # (B, 3H)
        r = jax.nn.sigmoid(gx[:, 0:H] + gh[:, 0:H])
        z = jax.nn.sigmoid(gx[:, H:2 * H] + gh[:, H:2 * H])
        n = jnp.tanh(gx[:, 2 * H:3 * H] + r * gh[:, 2 * H:3 * H])
        h = (1.0 - z) * n + z * h
        o_ref[t] = h                                                 # (B, H)
        return h

    h0 = jnp.zeros((B, H), jnp.float32)            # h_0 = 0 (PyTorch default)
    lax.fori_loop(0, L, step, h0, unroll=True)


def gru4rec_forward(input_embs, w_ih, w_hh):
    """UserEncoder_gru4rec.forward.  input_embs: (B, L, E); returns (B, L, H)."""
    B, L, E = input_embs.shape
    n_layers, H, threeH = w_hh.shape
    assert E == H and threeH == 3 * H and w_ih.shape == (n_layers, H, 3 * H)

    # Time-major inside the kernel; batch-first transposes stay in the wrapper.
    x_tm = jnp.transpose(input_embs, (1, 0, 2))    # (L, B, H)

    out_tm = pl.pallas_call(
        _gru4rec_kernel,
        grid=(n_layers,),
        out_shape=jax.ShapeDtypeStruct((L, B, H), jnp.float32),
        in_specs=[
            pl.BlockSpec((L, B, H), lambda l: (0, 0, 0)),
            pl.BlockSpec((1, H, 3 * H), lambda l: (l, 0, 0)),
            pl.BlockSpec((1, H, 3 * H), lambda l: (l, 0, 0)),
        ],
        out_specs=pl.BlockSpec((L, B, H), lambda l: (0, 0, 0)),
        scratch_shapes=[pltpu.VMEM((L, B, 3 * H), jnp.float32)],
        compiler_params=pltpu.CompilerParams(
            dimension_semantics=("arbitrary",)),   # layers are sequential
    )(x_tm, w_ih, w_hh)

    return jnp.transpose(out_tm, (1, 0, 2))        # back to (B, L, H)


# ----------------------------------------------------------------------------
# Pure-JAX reference (PyTorch nn.GRU semantics, bias=False, batch_first=True)
# ----------------------------------------------------------------------------
def gru_reference(x, w_ih, w_hh):
    B, L, H = x.shape
    seq = x.astype(jnp.float32)
    for layer in range(w_ih.shape[0]):
        h = jnp.zeros((B, H), jnp.float32)
        outs = []
        for t in range(L):
            gx = seq[:, t, :] @ w_ih[layer]
            gh = h @ w_hh[layer]
            r = jax.nn.sigmoid(gx[:, 0:H] + gh[:, 0:H])
            z = jax.nn.sigmoid(gx[:, H:2 * H] + gh[:, H:2 * H])
            n = jnp.tanh(gx[:, 2 * H:3 * H] + r * gh[:, 2 * H:3 * H])
            h = (1.0 - z) * n + z * h
            outs.append(h)
        seq = jnp.stack(outs, axis=1)
    return seq


# ----------------------------------------------------------------------------
# Demo
# ----------------------------------------------------------------------------
if __name__ == "__main__":
    # args: embedding_dim=32, block_num=2, drop_rate (identity at inference)
    B = 2
    SEQ_LEN = 8
    EMB_DIM = 32        # args.embedding_dim == hidden_size
    N_LAYERS = 2        # args.block_num

    key = jax.random.PRNGKey(0)
    k_x, k_ih, k_hh = jax.random.split(key, 3)

    def xavier_uniform(k, shape):
        # PyTorch xavier_uniform_ on (fan_out, fan_in)
        fan_out, fan_in = shape
        bound = (6.0 / (fan_in + fan_out)) ** 0.5
        return jax.random.uniform(k, shape, jnp.float32, -bound, bound)

    # PyTorch layout: weight_ih_l{k} (3H, H), weight_hh_l{k} (3H, H), gates [r, z, n].
    # Transpose to (H, 3H) so the kernel computes x @ W with [r|z|n] column blocks.
    w_ih = jnp.stack([xavier_uniform(kk, (3 * EMB_DIM, EMB_DIM)).T
                      for kk in jax.random.split(k_ih, N_LAYERS)])   # (n_layers, H, 3H)
    w_hh = jnp.stack([xavier_uniform(kk, (3 * EMB_DIM, EMB_DIM)).T
                      for kk in jax.random.split(k_hh, N_LAYERS)])   # (n_layers, H, 3H)

    input_embs = jax.random.normal(k_x, (B, SEQ_LEN, EMB_DIM), jnp.float32)

    fwd = jax.jit(gru4rec_forward)
    out = fwd(input_embs, w_ih, w_hh)
    jax.block_until_ready(out)

    ref = gru_reference(input_embs, w_ih, w_hh)
    assert out.shape == (B, SEQ_LEN, EMB_DIM) and out.dtype == jnp.float32
    assert bool(jnp.all(jnp.isfinite(out)))
    assert bool(jnp.allclose(out, ref, atol=1e-5, rtol=1e-5))
    print("KERNEL_OK")
</pallas_src>

<mosaic_0001>
module attributes {stable_mosaic.version = 11 : i64} {
  func.func @_gru4rec_kernel(%arg0: i32, %arg1: memref<8x2x32xf32, #tpu.memory_space<vmem>>, %arg2: memref<1x32x96xf32, #tpu.memory_space<vmem>>, %arg3: memref<1x32x96xf32, #tpu.memory_space<vmem>>, %arg4: memref<8x2x32xf32, #tpu.memory_space<vmem>>, %arg5: memref<8x2x96xf32, #tpu.memory_space<vmem>>) attributes {dimension_semantics = [#tpu.dimension_semantics<arbitrary>], iteration_bounds = array<i64: 2>, scalar_prefetch = 0 : i64, scratch_operands = 1 : i64, tpu.core_type = #tpu.core_type<tc>, window_params = [{pipeline_mode = #tpu.pipeline_mode<synchronous>, transform_indices = @transform_0, window_bounds = array<i64: 8, 2, 32>}, {transform_indices = @transform_1, window_bounds = array<i64: 1, 32, 96>}, {transform_indices = @transform_2, window_bounds = array<i64: 1, 32, 96>}, {pipeline_mode = #tpu.pipeline_mode<synchronous>, transform_indices = @transform_3, window_bounds = array<i64: 8, 2, 32>}]} {
    %c0_i32 = arith.constant 0 : i32
    %0 = arith.cmpi eq, %arg0, %c0_i32 : i32
    %1 = arith.extui %0 : i1 to i32
    %c0_i32_0 = arith.constant 0 : i32
    %2 = arith.cmpi ne, %1, %c0_i32_0 : i32
    scf.if %2 {
      %c0_78 = arith.constant 0 : index
      %c0_79 = arith.constant 0 : index
      %c0_80 = arith.constant 0 : index
      %285 = vector.load %arg1[%c0_78, %c0_79, %c0_80] : memref<8x2x32xf32, #tpu.memory_space<vmem>>, vector<8x2x32xf32>
      %c0_81 = arith.constant 0 : index
      %c0_82 = arith.constant 0 : index
      %c0_83 = arith.constant 0 : index
      %286 = vector.load %arg4[%c0_81, %c0_82, %c0_83] : memref<8x2x32xf32, #tpu.memory_space<vmem>>, vector<8x2x32xf32>
      tpu.vector_store %arg4[%c0_81, %c0_82, %c0_83], %285 {strides = array<i32>} : memref<8x2x32xf32, #tpu.memory_space<vmem>>, vector<8x2x32xf32>,
    } else {
    }
    %c0 = arith.constant 0 : index
    %c0_1 = arith.constant 0 : index
    %c0_2 = arith.constant 0 : index
    %3 = vector.load %arg2[%c0, %c0_1, %c0_2] : memref<1x32x96xf32, #tpu.memory_space<vmem>>, vector<1x32x96xf32>
    %4 = vector.shape_cast %3 : vector<1x32x96xf32> to vector<32x96xf32>
    %c0_3 = arith.constant 0 : index
    %c0_4 = arith.constant 0 : index
    %c0_5 = arith.constant 0 : index
    %5 = vector.load %arg3[%c0_3, %c0_4, %c0_5] : memref<1x32x96xf32, #tpu.memory_space<vmem>>, vector<1x32x96xf32>
    %6 = vector.shape_cast %5 : vector<1x32x96xf32> to vector<32x96xf32>
    %c0_6 = arith.constant 0 : index
    %c0_7 = arith.constant 0 : index
    %c0_8 = arith.constant 0 : index
    %7 = vector.load %arg4[%c0_6, %c0_7, %c0_8] : memref<8x2x32xf32, #tpu.memory_space<vmem>>, vector<8x2x32xf32>
    %8 = vector.shape_cast %7 : vector<8x2x32xf32> to vector<16x32xf32>
    %cst = arith.constant dense<0.000000e+00> : vector<16x96xf32>
    %9 = tpu.matmul %8, %4, %cst {dimension_numbers = #tpu.dot_dimension_numbers<[1], [0], [0], [1], [0, 0, 1, 1], [], []>} : vector<16x32xf32>, vector<32x96xf32>, vector<16x96xf32> -> vector<16x96xf32>
    %10 = vector.shape_cast %9 : vector<16x96xf32> to vector<8x2x96xf32>
    %c0_9 = arith.constant 0 : index
    %c0_10 = arith.constant 0 : index
    %c0_11 = arith.constant 0 : index
    %11 = vector.load %arg5[%c0_9, %c0_10, %c0_11] : memref<8x2x96xf32, #tpu.memory_space<vmem>>, vector<8x2x96xf32>
    tpu.vector_store %arg5[%c0_9, %c0_10, %c0_11], %10 {strides = array<i32>} : memref<8x2x96xf32, #tpu.memory_space<vmem>>, vector<8x2x96xf32>,
    %cst_12 = arith.constant 0.000000e+00 : f32
    %12 = vector.broadcast %cst_12 : f32 to vector<2x32xf32>
    %c0_i32_13 = arith.constant 0 : i32
    %13 = arith.index_cast %c0_i32_13 : i32 to index
    %c0_14 = arith.constant 0 : index
    %c0_15 = arith.constant 0 : index
    %14 = vector.load %arg5[%13, %c0_14, %c0_15] : memref<8x2x96xf32, #tpu.memory_space<vmem>>, vector<1x2x96xf32>
    %15 = vector.shape_cast %14 : vector<1x2x96xf32> to vector<2x96xf32>
    %cst_16 = arith.constant dense<0.000000e+00> : vector<2x96xf32>
    %16 = tpu.matmul %12, %6, %cst_16 {dimension_numbers = #tpu.dot_dimension_numbers<[1], [0], [0], [1], [0, 0, 1, 1], [], []>} : vector<2x32xf32>, vector<32x96xf32>, vector<2x96xf32> -> vector<2x96xf32>
    %17 = vector.extract_strided_slice %15 {offsets = [0, 0], sizes = [2, 32], strides = [1, 1]} : vector<2x96xf32> to vector<2x32xf32>
    %18 = vector.extract_strided_slice %16 {offsets = [0, 0], sizes = [2, 32], strides = [1, 1]} : vector<2x96xf32> to vector<2x32xf32>
    %19 = arith.addf %17, %18 : vector<2x32xf32>
    %20 = arith.negf %19 : vector<2x32xf32>
    %21 = math.exp %20 : vector<2x32xf32>
    %cst_17 = arith.constant 1.000000e+00 : f32
    %22 = vector.broadcast %cst_17 : f32 to vector<2x32xf32>
    %23 = arith.addf %22, %21 : vector<2x32xf32>
    %24 = arith.divf %22, %23 : vector<2x32xf32>
    %25 = vector.extract_strided_slice %15 {offsets = [0, 32], sizes = [2, 32], strides = [1, 1]} : vector<2x96xf32> to vector<2x32xf32>
    %26 = vector.extract_strided_slice %16 {offsets = [0, 32], sizes = [2, 32], strides = [1, 1]} : vector<2x96xf32> to vector<2x32xf32>
    %27 = arith.addf %25, %26 : vector<2x32xf32>
    %28 = arith.negf %27 : vector<2x32xf32>
    %29 = math.exp %28 : vector<2x32xf32>
    %cst_18 = arith.constant 1.000000e+00 : f32
    %30 = vector.broadcast %cst_18 : f32 to vector<2x32xf32>
    %31 = arith.addf %30, %29 : vector<2x32xf32>
    %32 = arith.divf %30, %31 : vector<2x32xf32>
    %33 = vector.extract_strided_slice %15 {offsets = [0, 64], sizes = [2, 32], strides = [1, 1]} : vector<2x96xf32> to vector<2x32xf32>
    %34 = vector.extract_strided_slice %16 {offsets = [0, 64], sizes = [2, 32], strides = [1, 1]} : vector<2x96xf32> to vector<2x32xf32>
    %35 = arith.mulf %24, %34 : vector<2x32xf32>
    %36 = arith.addf %33, %35 : vector<2x32xf32>
    %37 = math.tanh %36 : vector<2x32xf32>
    %cst_19 = arith.constant 1.000000e+00 : f32
    %38 = vector.broadcast %cst_19 : f32 to vector<2x32xf32>
    %39 = arith.subf %38, %32 : vector<2x32xf32>
    %40 = arith.mulf %39, %37 : vector<2x32xf32>
    %41 = arith.mulf %32, %12 : vector<2x32xf32>
    %42 = arith.addf %40, %41 : vector<2x32xf32>
    %43 = arith.index_cast %c0_i32_13 : i32 to index
    %c0_20 = arith.constant 0 : index
    %c0_21 = arith.constant 0 : index
    %44 = vector.load %arg4[%43, %c0_20, %c0_21] : memref<8x2x32xf32, #tpu.memory_space<vmem>>, vector<1x2x32xf32>
    %45 = vector.shape_cast %44 : vector<1x2x32xf32> to vector<2x32xf32>
    %46 = vector.shape_cast %42 : vector<2x32xf32> to vector<1x2x32xf32>
    tpu.vector_store %arg4[%43, %c0_20, %c0_21], %46 {strides = array<i32>} : memref<8x2x32xf32, #tpu.memory_space<vmem>>, vector<1x2x32xf32>,
    %c1_i32 = arith.constant 1 : i32
    %47 = arith.index_cast %c1_i32 : i32 to index
    %c0_22 = arith.constant 0 : index
    %c0_23 = arith.constant 0 : index
    %48 = vector.load %arg5[%47, %c0_22, %c0_23] : memref<8x2x96xf32, #tpu.memory_space<vmem>>, vector<1x2x96xf32>
    %49 = vector.shape_cast %48 : vector<1x2x96xf32> to vector<2x96xf32>
    %cst_24 = arith.constant dense<0.000000e+00> : vector<2x96xf32>
    %50 = tpu.matmul %42, %6, %cst_24 {dimension_numbers = #tpu.dot_dimension_numbers<[1], [0], [0], [1], [0, 0, 1, 1], [], []>} : vector<2x32xf32>, vector<32x96xf32>, vector<2x96xf32> -> vector<2x96xf32>
    %51 = vector.extract_strided_slice %49 {offsets = [0, 0], sizes = [2, 32], strides = [1, 1]} : vector<2x96xf32> to vector<2x32xf32>
    %52 = vector.extract_strided_slice %50 {offsets = [0, 0], sizes = [2, 32], strides = [1, 1]} : vector<2x96xf32> to vector<2x32xf32>
    %53 = arith.addf %51, %52 : vector<2x32xf32>
    %54 = arith.negf %53 : vector<2x32xf32>
    %55 = math.exp %54 : vector<2x32xf32>
    %cst_25 = arith.constant 1.000000e+00 : f32
    %56 = vector.broadcast %cst_25 : f32 to vector<2x32xf32>
    %57 = arith.addf %56, %55 : vector<2x32xf32>
    %58 = arith.divf %56, %57 : vector<2x32xf32>
    %59 = vector.extract_strided_slice %49 {offsets = [0, 32], sizes = [2, 32], strides = [1, 1]} : vector<2x96xf32> to vector<2x32xf32>
    %60 = vector.extract_strided_slice %50 {offsets = [0, 32], sizes = [2, 32], strides = [1, 1]} : vector<2x96xf32> to vector<2x32xf32>
    %61 = arith.addf %59, %60 : vector<2x32xf32>
    %62 = arith.negf %61 : vector<2x32xf32>
    %63 = math.exp %62 : vector<2x32xf32>
    %cst_26 = arith.constant 1.000000e+00 : f32
    %64 = vector.broadcast %cst_26 : f32 to vector<2x32xf32>
    %65 = arith.addf %64, %63 : vector<2x32xf32>
    %66 = arith.divf %64, %65 : vector<2x32xf32>
    %67 = vector.extract_strided_slice %49 {offsets = [0, 64], sizes = [2, 32], strides = [1, 1]} : vector<2x96xf32> to vector<2x32xf32>
    %68 = vector.extract_strided_slice %50 {offsets = [0, 64], sizes = [2, 32], strides = [1, 1]} : vector<2x96xf32> to vector<2x32xf32>
    %69 = arith.mulf %58, %68 : vector<2x32xf32>
    %70 = arith.addf %67, %69 : vector<2x32xf32>
    %71 = math.tanh %70 : vector<2x32xf32>
    %cst_27 = arith.constant 1.000000e+00 : f32
    %72 = vector.broadcast %cst_27 : f32 to vector<2x32xf32>
    %73 = arith.subf %72, %66 : vector<2x32xf32>
    %74 = arith.mulf %73, %71 : vector<2x32xf32>
    %75 = arith.mulf %66, %42 : vector<2x32xf32>
    %76 = arith.addf %74, %75 : vector<2x32xf32>
    %77 = arith.index_cast %c1_i32 : i32 to index
    %c0_28 = arith.constant 0 : index
    %c0_29 = arith.constant 0 : index
    %78 = vector.load %arg4[%77, %c0_28, %c0_29] : memref<8x2x32xf32, #tpu.memory_space<vmem>>, vector<1x2x32xf32>
    %79 = vector.shape_cast %78 : vector<1x2x32xf32> to vector<2x32xf32>
    %80 = vector.shape_cast %76 : vector<2x32xf32> to vector<1x2x32xf32>
    tpu.vector_store %arg4[%77, %c0_28, %c0_29], %80 {strides = array<i32>} : memref<8x2x32xf32, #tpu.memory_space<vmem>>, vector<1x2x32xf32>,
    %c2_i32 = arith.constant 2 : i32
    %81 = arith.index_cast %c2_i32 : i32 to index
    %c0_30 = arith.constant 0 : index
    %c0_31 = arith.constant 0 : index
    %82 = vector.load %arg5[%81, %c0_30, %c0_31] : memref<8x2x96xf32, #tpu.memory_space<vmem>>, vector<1x2x96xf32>
    %83 = vector.shape_cast %82 : vector<1x2x96xf32> to vector<2x96xf32>
    %cst_32 = arith.constant dense<0.000000e+00> : vector<2x96xf32>
    %84 = tpu.matmul %76, %6, %cst_32 {dimension_numbers = #tpu.dot_dimension_numbers<[1], [0], [0], [1], [0, 0, 1, 1], [], []>} : vector<2x32xf32>, vector<32x96xf32>, vector<2x96xf32> -> vector<2x96xf32>
    %85 = vector.extract_strided_slice %83 {offsets = [0, 0], sizes = [2, 32], strides = [1, 1]} : vector<2x96xf32> to vector<2x32xf32>
    %86 = vector.extract_strided_slice %84 {offsets = [0, 0], sizes = [2, 32], strides = [1, 1]} : vector<2x96xf32> to vector<2x32xf32>
    %87 = arith.addf %85, %86 : vector<2x32xf32>
    %88 = arith.negf %87 : vector<2x32xf32>
    %89 = math.exp %88 : vector<2x32xf32>
    %cst_33 = arith.constant 1.000000e+00 : f32
    %90 = vector.broadcast %cst_33 : f32 to vector<2x32xf32>
    %91 = arith.addf %90, %89 : vector<2x32xf32>
    %92 = arith.divf %90, %91 : vector<2x32xf32>
    %93 = vector.extract_strided_slice %83 {offsets = [0, 32], sizes = [2, 32], strides = [1, 1]} : vector<2x96xf32> to vector<2x32xf32>
    %94 = vector.extract_strided_slice %84 {offsets = [0, 32], sizes = [2, 32], strides = [1, 1]} : vector<2x96xf32> to vector<2x32xf32>
    %95 = arith.addf %93, %94 : vector<2x32xf32>
    %96 = arith.negf %95 : vector<2x32xf32>
    %97 = math.exp %96 : vector<2x32xf32>
    %cst_34 = arith.constant 1.000000e+00 : f32
    %98 = vector.broadcast %cst_34 : f32 to vector<2x32xf32>
    %99 = arith.addf %98, %97 : vector<2x32xf32>
    %100 = arith.divf %98, %99 : vector<2x32xf32>
    %101 = vector.extract_strided_slice %83 {offsets = [0, 64], sizes = [2, 32], strides = [1, 1]} : vector<2x96xf32> to vector<2x32xf32>
    %102 = vector.extract_strided_slice %84 {offsets = [0, 64], sizes = [2, 32], strides = [1, 1]} : vector<2x96xf32> to vector<2x32xf32>
    %103 = arith.mulf %92, %102 : vector<2x32xf32>
    %104 = arith.addf %101, %103 : vector<2x32xf32>
    %105 = math.tanh %104 : vector<2x32xf32>
    %cst_35 = arith.constant 1.000000e+00 : f32
    %106 = vector.broadcast %cst_35 : f32 to vector<2x32xf32>
    %107 = arith.subf %106, %100 : vector<2x32xf32>
    %108 = arith.mulf %107, %105 : vector<2x32xf32>
    %109 = arith.mulf %100, %76 : vector<2x32xf32>
    %110 = arith.addf %108, %109 : vector<2x32xf32>
    %111 = arith.index_cast %c2_i32 : i32 to index
    %c0_36 = arith.constant 0 : index
    %c0_37 = arith.constant 0 : index
    %112 = vector.load %arg4[%111, %c0_36, %c0_37] : memref<8x2x32xf32, #tpu.memory_space<vmem>>, vector<1x2x32xf32>
    %113 = vector.shape_cast %112 : vector<1x2x32xf32> to vector<2x32xf32>
    %114 = vector.shape_cast %110 : vector<2x32xf32> to vector<1x2x32xf32>
    tpu.vector_store %arg4[%111, %c0_36, %c0_37], %114 {strides = array<i32>} : memref<8x2x32xf32, #tpu.memory_space<vmem>>, vector<1x2x32xf32>,
    %c3_i32 = arith.constant 3 : i32
    %115 = arith.index_cast %c3_i32 : i32 to index
    %c0_38 = arith.constant 0 : index
    %c0_39 = arith.constant 0 : index
    %116 = vector.load %arg5[%115, %c0_38, %c0_39] : memref<8x2x96xf32, #tpu.memory_space<vmem>>, vector<1x2x96xf32>
    %117 = vector.shape_cast %116 : vector<1x2x96xf32> to vector<2x96xf32>
    %cst_40 = arith.constant dense<0.000000e+00> : vector<2x96xf32>
    %118 = tpu.matmul %110, %6, %cst_40 {dimension_numbers = #tpu.dot_dimension_numbers<[1], [0], [0], [1], [0, 0, 1, 1], [], []>} : vector<2x32xf32>, vector<32x96xf32>, vector<2x96xf32> -> vector<2x96xf32>
    %119 = vector.extract_strided_slice %117 {offsets = [0, 0], sizes = [2, 32], strides = [1, 1]} : vector<2x96xf32> to vector<2x32xf32>
    %120 = vector.extract_strided_slice %118 {offsets = [0, 0], sizes = [2, 32], strides = [1, 1]} : vector<2x96xf32> to vector<2x32xf32>
    %121 = arith.addf %119, %120 : vector<2x32xf32>
    %122 = arith.negf %121 : vector<2x32xf32>
    %123 = math.exp %122 : vector<2x32xf32>
    %cst_41 = arith.constant 1.000000e+00 : f32
    %124 = vector.broadcast %cst_41 : f32 to vector<2x32xf32>
    %125 = arith.addf %124, %123 : vector<2x32xf32>
    %126 = arith.divf %124, %125 : vector<2x32xf32>
    %127 = vector.extract_strided_slice %117 {offsets = [0, 32], sizes = [2, 32], strides = [1, 1]} : vector<2x96xf32> to vector<2x32xf32>
    %128 = vector.extract_strided_slice %118 {offsets = [0, 32], sizes = [2, 32], strides = [1, 1]} : vector<2x96xf32> to vector<2x32xf32>
    %129 = arith.addf %127, %128 : vector<2x32xf32>
    %130 = arith.negf %129 : vector<2x32xf32>
    %131 = math.exp %130 : vector<2x32xf32>
    %cst_42 = arith.constant 1.000000e+00 : f32
    %132 = vector.broadcast %cst_42 : f32 to vector<2x32xf32>
    %133 = arith.addf %132, %131 : vector<2x32xf32>
    %134 = arith.divf %132, %133 : vector<2x32xf32>
    %135 = vector.extract_strided_slice %117 {offsets = [0, 64], sizes = [2, 32], strides = [1, 1]} : vector<2x96xf32> to vector<2x32xf32>
    %136 = vector.extract_strided_slice %118 {offsets = [0, 64], sizes = [2, 32], strides = [1, 1]} : vector<2x96xf32> to vector<2x32xf32>
    %137 = arith.mulf %126, %136 : vector<2x32xf32>
    %138 = arith.addf %135, %137 : vector<2x32xf32>
    %139 = math.tanh %138 : vector<2x32xf32>
    %cst_43 = arith.constant 1.000000e+00 : f32
    %140 = vector.broadcast %cst_43 : f32 to vector<2x32xf32>
    %141 = arith.subf %140, %134 : vector<2x32xf32>
    %142 = arith.mulf %141, %139 : vector<2x32xf32>
    %143 = arith.mulf %134, %110 : vector<2x32xf32>
    %144 = arith.addf %142, %143 : vector<2x32xf32>
    %145 = arith.index_cast %c3_i32 : i32 to index
    %c0_44 = arith.constant 0 : index
    %c0_45 = arith.constant 0 : index
    %146 = vector.load %arg4[%145, %c0_44, %c0_45] : memref<8x2x32xf32, #tpu.memory_space<vmem>>, vector<1x2x32xf32>
    %147 = vector.shape_cast %146 : vector<1x2x32xf32> to vector<2x32xf32>
    %148 = vector.shape_cast %144 : vector<2x32xf32> to vector<1x2x32xf32>
    tpu.vector_store %arg4[%145, %c0_44, %c0_45], %148 {strides = array<i32>} : memref<8x2x32xf32, #tpu.memory_space<vmem>>, vector<1x2x32xf32>,
    %c4_i32 = arith.constant 4 : i32
    %149 = arith.index_cast %c4_i32 : i32 to index
    %c0_46 = arith.constant 0 : index
    %c0_47 = arith.constant 0 : index
    %150 = vector.load %arg5[%149, %c0_46, %c0_47] : memref<8x2x96xf32, #tpu.memory_space<vmem>>, vector<1x2x96xf32>
    %151 = vector.shape_cast %150 : vector<1x2x96xf32> to vector<2x96xf32>
    %cst_48 = arith.constant dense<0.000000e+00> : vector<2x96xf32>
    %152 = tpu.matmul %144, %6, %cst_48 {dimension_numbers = #tpu.dot_dimension_numbers<[1], [0], [0], [1], [0, 0, 1, 1], [], []>} : vector<2x32xf32>, vector<32x96xf32>, vector<2x96xf32> -> vector<2x96xf32>
    %153 = vector.extract_strided_slice %151 {offsets = [0, 0], sizes = [2, 32], strides = [1, 1]} : vector<2x96xf32> to vector<2x32xf32>
    %154 = vector.extract_strided_slice %152 {offsets = [0, 0], sizes = [2, 32], strides = [1, 1]} : vector<2x96xf32> to vector<2x32xf32>
    %155 = arith.addf %153, %154 : vector<2x32xf32>
    %156 = arith.negf %155 : vector<2x32xf32>
    %157 = math.exp %156 : vector<2x32xf32>
    %cst_49 = arith.constant 1.000000e+00 : f32
    %158 = vector.broadcast %cst_49 : f32 to vector<2x32xf32>
    %159 = arith.addf %158, %157 : vector<2x32xf32>
    %160 = arith.divf %158, %159 : vector<2x32xf32>
    %161 = vector.extract_strided_slice %151 {offsets = [0, 32], sizes = [2, 32], strides = [1, 1]} : vector<2x96xf32> to vector<2x32xf32>
    %162 = vector.extract_strided_slice %152 {offsets = [0, 32], sizes = [2, 32], strides = [1, 1]} : vector<2x96xf32> to vector<2x32xf32>
    %163 = arith.addf %161, %162 : vector<2x32xf32>
    %164 = arith.negf %163 : vector<2x32xf32>
    %165 = math.exp %164 : vector<2x32xf32>
    %cst_50 = arith.constant 1.000000e+00 : f32
    %166 = vector.broadcast %cst_50 : f32 to vector<2x32xf32>
    %167 = arith.addf %166, %165 : vector<2x32xf32>
    %168 = arith.divf %166, %167 : vector<2x32xf32>
    %169 = vector.extract_strided_slice %151 {offsets = [0, 64], sizes = [2, 32], strides = [1, 1]} : vector<2x96xf32> to vector<2x32xf32>
    %170 = vector.extract_strided_slice %152 {offsets = [0, 64], sizes = [2, 32], strides = [1, 1]} : vector<2x96xf32> to vector<2x32xf32>
    %171 = arith.mulf %160, %170 : vector<2x32xf32>
    %172 = arith.addf %169, %171 : vector<2x32xf32>
    %173 = math.tanh %172 : vector<2x32xf32>
    %cst_51 = arith.constant 1.000000e+00 : f32
    %174 = vector.broadcast %cst_51 : f32 to vector<2x32xf32>
    %175 = arith.subf %174, %168 : vector<2x32xf32>
    %176 = arith.mulf %175, %173 : vector<2x32xf32>
    %177 = arith.mulf %168, %144 : vector<2x32xf32>
    %178 = arith.addf %176, %177 : vector<2x32xf32>
    %179 = arith.index_cast %c4_i32 : i32 to index
    %c0_52 = arith.constant 0 : index
    %c0_53 = arith.constant 0 : index
    %180 = vector.load %arg4[%179, %c0_52, %c0_53] : memref<8x2x32xf32, #tpu.memory_space<vmem>>, vector<1x2x32xf32>
    %181 = vector.shape_cast %180 : vector<1x2x32xf32> to vector<2x32xf32>
    %182 = vector.shape_cast %178 : vector<2x32xf32> to vector<1x2x32xf32>
    tpu.vector_store %arg4[%179, %c0_52, %c0_53], %182 {strides = array<i32>} : memref<8x2x32xf32, #tpu.memory_space<vmem>>, vector<1x2x32xf32>,
    %c5_i32 = arith.constant 5 : i32
    %183 = arith.index_cast %c5_i32 : i32 to index
    %c0_54 = arith.constant 0 : index
    %c0_55 = arith.constant 0 : index
    %184 = vector.load %arg5[%183, %c0_54, %c0_55] : memref<8x2x96xf32, #tpu.memory_space<vmem>>, vector<1x2x96xf32>
    %185 = vector.shape_cast %184 : vector<1x2x96xf32> to vector<2x96xf32>
    %cst_56 = arith.constant dense<0.000000e+00> : vector<2x96xf32>
    %186 = tpu.matmul %178, %6, %cst_56 {dimension_numbers = #tpu.dot_dimension_numbers<[1], [0], [0], [1], [0, 0, 1, 1], [], []>} : vector<2x32xf32>, vector<32x96xf32>, vector<2x96xf32> -> vector<2x96xf32>
    %187 = vector.extract_strided_slice %185 {offsets = [0, 0], sizes = [2, 32], strides = [1, 1]} : vector<2x96xf32> to vector<2x32xf32>
    %188 = vector.extract_strided_slice %186 {offsets = [0, 0], sizes = [2, 32], strides = [1, 1]} : vector<2x96xf32> to vector<2x32xf32>
    %189 = arith.addf %187, %188 : vector<2x32xf32>
    %190 = arith.negf %189 : vector<2x32xf32>
    %191 = math.exp %190 : vector<2x32xf32>
    %cst_57 = arith.constant 1.000000e+00 : f32
    %192 = vector.broadcast %cst_57 : f32 to vector<2x32xf32>
    %193 = arith.addf %192, %191 : vector<2x32xf32>
    %194 = arith.divf %192, %193 : vector<2x32xf32>
    %195 = vector.extract_strided_slice %185 {offsets = [0, 32], sizes = [2, 32], strides = [1, 1]} : vector<2x96xf32> to vector<2x32xf32>
    %196 = vector.extract_strided_slice %186 {offsets = [0, 32], sizes = [2, 32], strides = [1, 1]} : vector<2x96xf32> to vector<2x32xf32>
    %197 = arith.addf %195, %196 : vector<2x32xf32>
    %198 = arith.negf %197 : vector<2x32xf32>
    %199 = math.exp %198 : vector<2x32xf32>
    %cst_58 = arith.constant 1.000000e+00 : f32
    %200 = vector.broadcast %cst_58 : f32 to vector<2x32xf32>
    %201 = arith.addf %200, %199 : vector<2x32xf32>
    %202 = arith.divf %200, %201 : vector<2x32xf32>
    %203 = vector.extract_strided_slice %185 {offsets = [0, 64], sizes = [2, 32], strides = [1, 1]} : vector<2x96xf32> to vector<2x32xf32>
    %204 = vector.extract_strided_slice %186 {offsets = [0, 64], sizes = [2, 32], strides = [1, 1]} : vector<2x96xf32> to vector<2x32xf32>
    %205 = arith.mulf %194, %204 : vector<2x32xf32>
    %206 = arith.addf %203, %205 : vector<2x32xf32>
    %207 = math.tanh %206 : vector<2x32xf32>
    %cst_59 = arith.constant 1.000000e+00 : f32
    %208 = vector.broadcast %cst_59 : f32 to vector<2x32xf32>
    %209 = arith.subf %208, %202 : vector<2x32xf32>
    %210 = arith.mulf %209, %207 : vector<2x32xf32>
    %211 = arith.mulf %202, %178 : vector<2x32xf32>
    %212 = arith.addf %210, %211 : vector<2x32xf32>
    %213 = arith.index_cast %c5_i32 : i32 to index
    %c0_60 = arith.constant 0 : index
    %c0_61 = arith.constant 0 : index
    %214 = vector.load %arg4[%213, %c0_60, %c0_61] : memref<8x2x32xf32, #tpu.memory_space<vmem>>, vector<1x2x32xf32>
    %215 = vector.shape_cast %214 : vector<1x2x32xf32> to vector<2x32xf32>
    %216 = vector.shape_cast %212 : vector<2x32xf32> to vector<1x2x32xf32>
    tpu.vector_store %arg4[%213, %c0_60, %c0_61], %216 {strides = array<i32>} : memref<8x2x32xf32, #tpu.memory_space<vmem>>, vector<1x2x32xf32>,
    %c6_i32 = arith.constant 6 : i32
    %217 = arith.index_cast %c6_i32 : i32 to index
    %c0_62 = arith.constant 0 : index
    %c0_63 = arith.constant 0 : index
    %218 = vector.load %arg5[%217, %c0_62, %c0_63] : memref<8x2x96xf32, #tpu.memory_space<vmem>>, vector<1x2x96xf32>
    %219 = vector.shape_cast %218 : vector<1x2x96xf32> to vector<2x96xf32>
    %cst_64 = arith.constant dense<0.000000e+00> : vector<2x96xf32>
    %220 = tpu.matmul %212, %6, %cst_64 {dimension_numbers = #tpu.dot_dimension_numbers<[1], [0], [0], [1], [0, 0, 1, 1], [], []>} : vector<2x32xf32>, vector<32x96xf32>, vector<2x96xf32> -> vector<2x96xf32>
    %221 = vector.extract_strided_slice %219 {offsets = [0, 0], sizes = [2, 32], strides = [1, 1]} : vector<2x96xf32> to vector<2x32xf32>
    %222 = vector.extract_strided_slice %220 {offsets = [0, 0], sizes = [2, 32], strides = [1, 1]} : vector<2x96xf32> to vector<2x32xf32>
    %223 = arith.addf %221, %222 : vector<2x32xf32>
    %224 = arith.negf %223 : vector<2x32xf32>
    %225 = math.exp %224 : vector<2x32xf32>
    %cst_65 = arith.constant 1.000000e+00 : f32
    %226 = vector.broadcast %cst_65 : f32 to vector<2x32xf32>
    %227 = arith.addf %226, %225 : vector<2x32xf32>
    %228 = arith.divf %226, %227 : vector<2x32xf32>
    %229 = vector.extract_strided_slice %219 {offsets = [0, 32], sizes = [2, 32], strides = [1, 1]} : vector<2x96xf32> to vector<2x32xf32>
    %230 = vector.extract_strided_slice %220 {offsets = [0, 32], sizes = [2, 32], strides = [1, 1]} : vector<2x96xf32> to vector<2x32xf32>
    %231 = arith.addf %229, %230 : vector<2x32xf32>
    %232 = arith.negf %231 : vector<2x32xf32>
    %233 = math.exp %232 : vector<2x32xf32>
    %cst_66 = arith.constant 1.000000e+00 : f32
    %234 = vector.broadcast %cst_66 : f32 to vector<2x32xf32>
    %235 = arith.addf %234, %233 : vector<2x32xf32>
    %236 = arith.divf %234, %235 : vector<2x32xf32>
    %237 = vector.extract_strided_slice %219 {offsets = [0, 64], sizes = [2, 32], strides = [1, 1]} : vector<2x96xf32> to vector<2x32xf32>
    %238 = vector.extract_strided_slice %220 {offsets = [0, 64], sizes = [2, 32], strides = [1, 1]} : vector<2x96xf32> to vector<2x32xf32>
    %239 = arith.mulf %228, %238 : vector<2x32xf32>
    %240 = arith.addf %237, %239 : vector<2x32xf32>
    %241 = math.tanh %240 : vector<2x32xf32>
    %cst_67 = arith.constant 1.000000e+00 : f32
    %242 = vector.broadcast %cst_67 : f32 to vector<2x32xf32>
    %243 = arith.subf %242, %236 : vector<2x32xf32>
    %244 = arith.mulf %243, %241 : vector<2x32xf32>
    %245 = arith.mulf %236, %212 : vector<2x32xf32>
    %246 = arith.addf %244, %245 : vector<2x32xf32>
    %247 = arith.index_cast %c6_i32 : i32 to index
    %c0_68 = arith.constant 0 : index
    %c0_69 = arith.constant 0 : index
    %248 = vector.load %arg4[%247, %c0_68, %c0_69] : memref<8x2x32xf32, #tpu.memory_space<vmem>>, vector<1x2x32xf32>
    %249 = vector.shape_cast %248 : vector<1x2x32xf32> to vector<2x32xf32>
    %250 = vector.shape_cast %246 : vector<2x32xf32> to vector<1x2x32xf32>
    tpu.vector_store %arg4[%247, %c0_68, %c0_69], %250 {strides = array<i32>} : memref<8x2x32xf32, #tpu.memory_space<vmem>>, vector<1x2x32xf32>,
    %c7_i32 = arith.constant 7 : i32
    %251 = arith.index_cast %c7_i32 : i32 to index
    %c0_70 = arith.constant 0 : index
    %c0_71 = arith.constant 0 : index
    %252 = vector.load %arg5[%251, %c0_70, %c0_71] : memref<8x2x96xf32, #tpu.memory_space<vmem>>, vector<1x2x96xf32>
    %253 = vector.shape_cast %252 : vector<1x2x96xf32> to vector<2x96xf32>
    %cst_72 = arith.constant dense<0.000000e+00> : vector<2x96xf32>
    %254 = tpu.matmul %246, %6, %cst_72 {dimension_numbers = #tpu.dot_dimension_numbers<[1], [0], [0], [1], [0, 0, 1, 1], [], []>} : vector<2x32xf32>, vector<32x96xf32>, vector<2x96xf32> -> vector<2x96xf32>
    %255 = vector.extract_strided_slice %253 {offsets = [0, 0], sizes = [2, 32], strides = [1, 1]} : vector<2x96xf32> to vector<2x32xf32>
    %256 = vector.extract_strided_slice %254 {offsets = [0, 0], sizes = [2, 32], strides = [1, 1]} : vector<2x96xf32> to vector<2x32xf32>
    %257 = arith.addf %255, %256 : vector<2x32xf32>
    %258 = arith.negf %257 : vector<2x32xf32>
    %259 = math.exp %258 : vector<2x32xf32>
    %cst_73 = arith.constant 1.000000e+00 : f32
    %260 = vector.broadcast %cst_73 : f32 to vector<2x32xf32>
    %261 = arith.addf %260, %259 : vector<2x32xf32>
    %262 = arith.divf %260, %261 : vector<2x32xf32>
    %263 = vector.extract_strided_slice %253 {offsets = [0, 32], sizes = [2, 32], strides = [1, 1]} : vector<2x96xf32> to vector<2x32xf32>
    %264 = vector.extract_strided_slice %254 {offsets = [0, 32], sizes = [2, 32], strides = [1, 1]} : vector<2x96xf32> to vector<2x32xf32>
    %265 = arith.addf %263, %264 : vector<2x32xf32>
    %266 = arith.negf %265 : vector<2x32xf32>
    %267 = math.exp %266 : vector<2x32xf32>
    %cst_74 = arith.constant 1.000000e+00 : f32
    %268 = vector.broadcast %cst_74 : f32 to vector<2x32xf32>
    %269 = arith.addf %268, %267 : vector<2x32xf32>
    %270 = arith.divf %268, %269 : vector<2x32xf32>
    %271 = vector.extract_strided_slice %253 {offsets = [0, 64], sizes = [2, 32], strides = [1, 1]} : vector<2x96xf32> to vector<2x32xf32>
    %272 = vector.extract_strided_slice %254 {offsets = [0, 64], sizes = [2, 32], strides = [1, 1]} : vector<2x96xf32> to vector<2x32xf32>
    %273 = arith.mulf %262, %272 : vector<2x32xf32>
    %274 = arith.addf %271, %273 : vector<2x32xf32>
    %275 = math.tanh %274 : vector<2x32xf32>
    %cst_75 = arith.constant 1.000000e+00 : f32
    %276 = vector.broadcast %cst_75 : f32 to vector<2x32xf32>
    %277 = arith.subf %276, %270 : vector<2x32xf32>
    %278 = arith.mulf %277, %275 : vector<2x32xf32>
    %279 = arith.mulf %270, %246 : vector<2x32xf32>
    %280 = arith.addf %278, %279 : vector<2x32xf32>
    %281 = arith.index_cast %c7_i32 : i32 to index
    %c0_76 = arith.constant 0 : index
    %c0_77 = arith.constant 0 : index
    %282 = vector.load %arg4[%281, %c0_76, %c0_77] : memref<8x2x32xf32, #tpu.memory_space<vmem>>, vector<1x2x32xf32>
    %283 = vector.shape_cast %282 : vector<1x2x32xf32> to vector<2x32xf32>
    %284 = vector.shape_cast %280 : vector<2x32xf32> to vector<1x2x32xf32>
    tpu.vector_store %arg4[%281, %c0_76, %c0_77], %284 {strides = array<i32>} : memref<8x2x32xf32, #tpu.memory_space<vmem>>, vector<1x2x32xf32>,
    %c8_i32 = arith.constant 8 : i32
    return
  }
  func.func @transform_0(%arg0: i32) -> (i32, i32, i32) {
    %c0_i32 = arith.constant 0 : i32
    %c0_i32_0 = arith.constant 0 : i32
    %c0_i32_1 = arith.constant 0 : i32
    %c0_i32_2 = arith.constant 0 : i32
    return %c0_i32, %c0_i32_0, %c0_i32_1 : i32, i32, i32
  }
  func.func @transform_1(%arg0: i32) -> (i32, i32, i32) {
    %c0_i32 = arith.constant 0 : i32
    %c0_i32_0 = arith.constant 0 : i32
    %c0_i32_1 = arith.constant 0 : i32
    return %arg0, %c0_i32, %c0_i32_0 : i32, i32, i32
  }
  func.func @transform_2(%arg0: i32) -> (i32, i32, i32) {
    %c0_i32 = arith.constant 0 : i32
    %c0_i32_0 = arith.constant 0 : i32
    %c0_i32_1 = arith.constant 0 : i32
    return %arg0, %c0_i32, %c0_i32_0 : i32, i32, i32
  }
  func.func @transform_3(%arg0: i32) -> (i32, i32, i32) {
    %c0_i32 = arith.constant 0 : i32
    %c0_i32_0 = arith.constant 0 : i32
    %c0_i32_1 = arith.constant 0 : i32
    %c0_i32_2 = arith.constant 0 : i32
    return %c0_i32, %c0_i32_0, %c0_i32_1 : i32, i32, i32
  }
}

</mosaic_0001>

<bundles_post_ra>
// kernel: gru4rec_forward.1
= control target key start
LH: loop header
LB: loop body
LE: loop exit
PB: predicated region body
PF: predicated region fallthrough
CT: control target
= control target key end

     0   :  { %8 = vsyncpa [#allocation4], 0  ;;  %s2162_s0 = inlined_call_operand.vmem [shape: f32[8,2,32], index: 0, kind: input, shape index: {}]   ;;  %s2163_s1 = inlined_call_operand.hbm [shape: f32[2,32,96], index: 1, kind: input, shape index: {}]   ;;  %s2164_s2 = inlined_call_operand.hbm [shape: f32[2,32,96], index: 2, kind: input, shape index: {}]   ;;  %s2165_s3 = inlined_call_operand.vmem [shape: f32[8,2,32], index: 3, kind: output, shape index: {}]  }
   0x1   :  { %10 = vsyncpa [#allocation4 + $0x1], 0 }
   0x2   :  { %11 = vsyncpa [#allocation6], 0 }
   0x3   :  { %13 = vsyncpa [#allocation6 + $0x1], 0  ;;  %s1748_s12 = smov 0   ;;  %s1750_s13 = smov 0  }
   0x4   :  { %s1752_s14 = smov 0   ;;  %s1754_s15 = smov 0  }
   0x5 LB: > { %s1338_s16 = sadd.s32 4294967295, %s1717_s15   ;;  %s1768_s17 = sadd.s32 1, %s1717_s15   ;;  %s1717_s15 = sphi %s1754_s15, %s2175_s15   ;;  %s1713_s14 = sphi %s1752_s14, %s2174_s14   ;;  %s1709_s13 = sphi %s1750_s13, %s2173_s13   ;;  %s1705_s12 = sphi %s1748_s12, %s2172_s12  }
   0x6   : > { %s44_s18 = ssub.s32 %s1717_s15, %s1768_s17  ;;  %s47_s19 = sadd.s32 1, %s1713_s14 }
   0x7   : > { %p45_p0 = scmp.eq.s32.totalorder %s44_s18, 0  ;;  %p54_p1 = scmp.ne.s32.totalorder %s1713_s14, %s1709_s13 }
   0x8   : > { %p55_p2 = scmp.eq.s32.totalorder %s1717_s15, 0  ;;  %p60_p3 = scmp.ne.s32.totalorder %s1709_s13, %s1705_s12 }
   0x9   : > { %s1778_s20 = scalar_select %p45_p0, %s1713_s14, %s47_s19  }
   0xa   : > { %p56_p4 = por %p55_p2, %p54_p1  ;;  %p61_p5 = scmp.eq.s32.totalorder %s1338_s16, 0 }
   0xb   : > { %p1535_p6 = scmp.lt.s32.totalorder %s1717_s15, 2  ;;  %s1788_s22 = sand.u32 1, %s1713_s14  }
   0xc   : > { %p1783_p7 = por %p61_p5, %p60_p3  ;;  %s1341_s23 = sshll.u32 %s1788_s22, 5 }
   0xd   : > { %s1377_s24 = sshll.u32 %s1717_s15, 9  ;;  %s138_s28 = scalar_lea.vmem [#allocation3], %s1341_s23 }
   0xe   : > { %s2167_s21 = scalar_select %p1783_p7, 1, 0 }
   0xf   : > { %s1797_s27 = scalar_lea.hbm %s2163_s1, %s1377_s24  ;;  %s145_s29 = sshll.u32 %s138_s28, 4  ;;  %s1801_s29 = int_to_ptr.vmem [resolvable:$true] %s145_s29 }
  0x10   : > { %p1803_p8 = pnand %p1535_p6, %p56_p4  ;;  %s135_s4 = scalar_lea.sflag [#allocation4], %s1788_s22 }
  0x11   : > { %s1623_s5 = scalar_lea.hbm %s1797_s27, 512  ;;  %s1628_s8 = scalar_lea.hbm %s2163_s1, 1024 }
  0x12   : > { %p1624_p10 = scmp.ne.s32.totalorder %s1797_s27, %s1623_s5  ;;  %p1625_p11 = pneg %p1803_p8 }
  0x13   : > { %p1629_p0 = scmp.lt.s32.totalorder %s1797_s27, %s2163_s1  ;;  %p1630_p1 = scmp.lt.s32.totalorder %s1628_s8, %s1623_s5 }
  0x14   : > { %p1626_p12 = pnand %p1625_p11, %p1624_p10 }
  0x15   : > { %p1631_p2 = por %p1630_p1, %p1629_p0 }
  0x16   : > { %p1627_p13 = pneg %p1626_p12 }
  0x18   : > { %p1632_p3 = pnand %p1631_p2, %p1627_p13 }
  0x1a   : > { %1635 = shalt.err (!%p1632_p3)
}
  0x1b   : > { %s1636_s11 = scalar_lea.vmem %s1801_s29, 512  ;;  %s1719_s12 = smov [#allocation3]  }
  0x1c   : > { %p1637_p4 = scmp.ne.s32.totalorder %s1801_s29, %s1636_s11  ;;  %s1641_s18 = sshll.u32 %s1719_s12, 4  ;;  %s1642_s18 = int_to_ptr.vmem [resolvable:$false] %s1641_s18 }
  0x1d   : > { %s1643_s19 = scalar_lea.vmem %s1642_s18, 1024  ;;  %p1644_p10 = scmp.lt.s32.totalorder %s1801_s29, %s1642_s18 }
  0x1e   : > { %p1639_p5 = pnand %p1637_p4, %p1625_p11  ;;  %p1645_p12 = scmp.lt.s32.totalorder %s1643_s19, %s1636_s11 }
  0x20   : > { %p1640_p6 = pneg %p1639_p5  ;;  %p1646_p9 = por %p1645_p12, %p1644_p10 }
  0x22   : > { %p1647_p0 = pnand %p1646_p9, %p1640_p6 }
  0x24   : > { %1650 = shalt.err (!%p1647_p0)
}
  0x25   : > { %s1720_s25 = smov 128   ;;  %s1721_s26 = smov 8  }
  0x26   : > { %1531 = dma.hbm_to_vmem [thread:$0]  (!%p1803_p8), %s1797_s27, 512, %s1801_s29, %s135_s4, %s1720_s25, %s1720_s25, %s1721_s26  }
  0x27   : > { %p174_p9 = scmp.lt.s32.totalorder %s1717_s15, 3  ;;  %s1844_s6 = scalar_lea.hbm %s2164_s2, %s1377_s24 }
  0x28   : > { %p2169_p13 = scmp.ge.s32.totalorder %s1717_s15, 1  ;;  %s159_s8 = scalar_lea.vmem [#allocation5], %s1341_s23 }
  0x29   : > { %s166_s9 = sshll.u32 %s159_s8, 4  ;;  %s156_s27 = scalar_lea.sflag [#allocation6], %s1788_s22  ;;  %s1854_s9 = int_to_ptr.vmem [resolvable:$true] %s166_s9 }
  0x2a   : > { %p1848_p1 = pnand %p2169_p13, %p174_p9  ;;  %s1651_s29 = scalar_lea.hbm %s1844_s6, 512 }
  0x2b   : > { %p1652_p2 = scmp.ne.s32.totalorder %s1844_s6, %s1651_s29  ;;  %s1656_s10 = scalar_lea.hbm %s2164_s2, 1024 }
  0x2c   : > { %p1657_p5 = scmp.lt.s32.totalorder %s1844_s6, %s2164_s2  ;;  %p1658_p6 = scmp.lt.s32.totalorder %s1656_s10, %s1651_s29 }
  0x2d   : > { %p1654_p3 = pnand %p1652_p2, %p1625_p11 }
  0x2e   : > { %p1659_p10 = por %p1658_p6, %p1657_p5 }
  0x2f   : > { %p1655_p4 = pneg %p1654_p3 }
  0x31   : > { %p1660_p12 = pnand %p1659_p10, %p1655_p4 }
  0x33   : > { %1663 = shalt.err (!%p1660_p12)
}
  0x34   : > { %s1664_s22 = scalar_lea.vmem %s1854_s9, 512  ;;  %s1722_s23 = smov [#allocation5]  }
  0x35   : > { %p1665_p0 = scmp.ne.s32.totalorder %s1854_s9, %s1664_s22  ;;  %s1669_s18 = sshll.u32 %s1722_s23, 4  ;;  %s1670_s18 = int_to_ptr.vmem [resolvable:$false] %s1669_s18 }
  0x36   : > { %s1671_s19 = scalar_lea.vmem %s1670_s18, 1024  ;;  %p1672_p2 = scmp.lt.s32.totalorder %s1854_s9, %s1670_s18 }
  0x37   : > { %p1667_p9 = pnand %p1665_p0, %p1625_p11  ;;  %p1673_p3 = scmp.lt.s32.totalorder %s1671_s19, %s1664_s22 }
  0x39   : > { %p1668_p13 = pneg %p1667_p9  ;;  %p1674_p7 = por %p1673_p3, %p1672_p2 }
  0x3b   : > { %p1675_p5 = pnand %p1674_p7, %p1668_p13 }
  0x3d   : > { %1678 = shalt.err (!%p1675_p5)
}
  0x3e   : > { %1534 = dma.hbm_to_vmem [thread:$0]  (!%p1803_p8), %s1844_s6, 512, %s1854_s9, %s156_s27, %s1720_s25, %s1720_s25, %s1721_s26  }
  0x3f   : > { %178 = sbr.rel (%p1848_p1) target bundleno = 5494 (0x1576), region = 32  ;;  %s180_s28 = sand.u32 (!%p1848_p1), 1, %s1709_s13  }
  0x40   : > { %s1348_s5 = sshll.u32 (!%p1848_p1), %s180_s28, 5  ;;  %s181_s8 = scalar_lea.sflag (!%p1848_p1), [#allocation4], %s180_s28 }
  0x41   : > { %s1885_s29 = scalar_lea.vmem (!%p1848_p1), [#allocation3], %s1348_s5  ;;  %p2171_p7 = scmp.ne.s32.totalorder (!%p1848_p1), %s2167_s21, 0 }
  0x44   : > { %1696 = dma.done.wait (%p2171_p7), %s181_s8, 512  }
  0x45   : > { %1698 = vsyncadd (%p2171_p7), %s181_s8, 4294966784  ;;  %s190_s30 = scalar_lea.sflag [#allocation6], %s180_s28  ;;  %s1891_s24 = scalar_lea.vmem [#allocation5], %s1348_s5 }
  0x46   : > { %1700 = dma.done.wait (%p2171_p7), %s190_s30, 512  }
  0x47   : > { %1702 = vsyncadd (%p2171_p7), %s190_s30, 4294966784  ;;  %p1350_p8 = scmp.ne.s32.totalorder %s1338_s16, 0 }
  0x49   : > { %219 = sbr.rel (%p1350_p8) target bundleno = 84 (0x54), region = 44 }
  0x4e   : > { %v220_v0 = vld [vmem:[%s2162_s0] sm:$0x3]  ;;  %vm228_vm0 = vcmask 254976   ;;  %v221_v1 = vld [vmem:[%s2162_s0 + $0x2] sm:$0x3] }
  0x4f   : > { %229 = vst.msk [vmem:[%s2165_s3] sm:$0x3] %vm228_vm0, %v220_v0  ;;  %230 = vst.msk [vmem:[%s2165_s3 + $0x2] sm:$0x3] %vm228_vm0, %v221_v1  ;;  %v222_v2 = vld [vmem:[%s2162_s0 + $0x4] sm:$0x3] }
  0x50   : > { %v223_v3 = vld [vmem:[%s2162_s0 + $0x6] sm:$0x3]  ;;  %v224_v4 = vld [vmem:[%s2162_s0 + $0x8] sm:$0x3]  ;;  %231 = vst.msk [vmem:[%s2165_s3 + $0x4] sm:$0x3] %vm228_vm0, %v222_v2 }
  0x51   : > { %232 = vst.msk [vmem:[%s2165_s3 + $0x6] sm:$0x3] %vm228_vm0, %v223_v3  ;;  %233 = vst.msk [vmem:[%s2165_s3 + $0x8] sm:$0x3] %vm228_vm0, %v224_v4  ;;  %v225_v5 = vld [vmem:[%s2162_s0 + $0xa] sm:$0x3] }
  0x52   : > { %v226_v6 = vld [vmem:[%s2162_s0 + $0xc] sm:$0x3]  ;;  %v227_v7 = vld [vmem:[%s2162_s0 + $0xe] sm:$0x3]  ;;  %234 = vst.msk [vmem:[%s2165_s3 + $0xa] sm:$0x3] %vm228_vm0, %v225_v5 }
  0x53   : > { %235 = vst.msk [vmem:[%s2165_s3 + $0xc] sm:$0x3] %vm228_vm0, %v226_v6  ;;  %236 = vst.msk [vmem:[%s2165_s3 + $0xe] sm:$0x3] %vm228_vm0, %v227_v7 }
  0x54 PF: > { %v1948_v8 = vld [vmem:[%s1891_s24 + $0x18] sm:$0xff]  ;;  %v266_v10 = vlaneseq  ;;  %v1723_v11 = vmov 0.0   ;;  %v1953_v12 = vld [vmem:[%s1891_s24 + $0x10] sm:$0xff]  ;;  %v1958_v14 = vld [vmem:[%s1891_s24 + $0x8] sm:$0xff]  ;;  %v1724_v17 = vmov 1983009808  }
  0x55   : > { %v240_v9 = vld [vmem:[%s1885_s29 + $0x18] sm:$0xff]  ;;  %1436 = vmatprep.subr.mxu1 %v1723_v11  ;;  %v239_v13 = vld [vmem:[%s1885_s29 + $0x10] sm:$0xff]  ;;  %v238_v15 = vld [vmem:[%s1885_s29 + $0x8] sm:$0xff]  ;;  %v264_v18 = vunpack.c.l.s4 %v1724_v17  ;;  %vm1725_vm1 = vmmov 0   ;;  %vm295_vm2 = vcmask 261120   ;;  %vm419_vm3 = vcmask 779264  }
  0x56   : > { %1425 = vmatprep.subr.mxu0 %v240_v9  ;;  %1437 = vmatpush3.msra.mxu1 %v1948_v8  ;;  %v245_v16 = vld [vmem:[%s2165_s3] sm:$0x3]  ;;  %v267_v19 = vshrl.u32 %v266_v10, 7  ;;  %v246_v20 = vld [vmem:[%s2165_s3 + $0x2] sm:$0x3]  ;;  %v1986_v29 = vld [vmem:[%s1891_s24] sm:$0xff] }
  0x57   : > { %1426 = vmatpush3.msra.mxu0 %v240_v9  ;;  %1438 = vmatprep.subr.mxu1 %v1723_v11  ;;  %v247_v21 = vld [vmem:[%s2165_s3 + $0x4] sm:$0x3]  ;;  %v261_v23 = vcombine.low %v245_v16, %v246_v20  ;;  %v265_v25 = vunpack.c.0.s8 %v264_v18  ;;  %v237_v30 = vld [vmem:[%s1885_s29] sm:$0xff]  ;;  %s1726_s29 = smov 64   ;;  %s1727_s24 = smov 96   ;;  %vm532_vm4 = vcmask 254976  }
  0x58   : > { %1427 = vmatprep.subr.mxu0 %v239_v13  ;;  %v248_v22 = vld [vmem:[%s2165_s3 + $0x6] sm:$0x3]  ;;  %1439 = vmatpush3.msra.mxu1 %v1953_v12  ;;  %v249_v26 = vld [vmem:[%s2165_s3 + $0x8] sm:$0x3] }
  0x59   : > { %1428 = vmatpush3.msra.mxu0 %v239_v13  ;;  %v262_v24 = vcombine.low %v247_v21, %v248_v22  ;;  %v250_v27 = vld [vmem:[%s2165_s3 + $0xa] sm:$0x3]  ;;  %1440 = vmatprep.subr.mxu1 %v1723_v11  ;;  %v268_v33 = vsub.s32 %v265_v25, %v267_v19 }
  0x5a   : > { %v251_v28 = vld [vmem:[%s2165_s3 + $0xc] sm:$0x3]  ;;  %1429 = vmatprep.subr.mxu0 %v238_v15  ;;  %v252_v31 = vld [vmem:[%s2165_s3 + $0xe] sm:$0x3]  ;;  %v278_v32 = vcombine.low %v249_v26, %v250_v27  ;;  %1441 = vmatpush3.msra.mxu1 %v1958_v14 }
  0x5b   : > { %1444 = vmatprep.mubr.msk.f32.mxu1 %vm1725_vm1, %v1723_v11  ;;  %v279_v34 = vcombine.low %v251_v28, %v252_v31  ;;  %1442 = vmatprep.subr.mxu1 %v1723_v11  ;;  %v269_v35 = vrot.slane %v261_v23, %v268_v33  ;;  %v276_v36 = vrot.slane %v262_v24, %v268_v33 }
  0x5c   : > { %1430 = vmatpush3.msra.mxu0 %v238_v15  ;;  %1443 = vmatpush3.msra.mxu1 %v1986_v29  ;;  %v286_v37 = vrot.slane %v278_v32, %v268_v33 }
  0x5d   : > { %1431 = vmatprep.subr.mxu0 %v237_v30  ;;  %1445 = vmatmul.mubr.f32.vlgmr.msra.gmra.mxu1 %v1723_v11  ;;  %v293_v38 = vrot.slane %v279_v34, %v268_v33  ;;  %v277_v39 = vcombine.low %v269_v35, %v276_v36 }
  0x5e   : > { %1432 = vmatpush3.msra.mxu0 %v237_v30  ;;  %1458 = vmatprep.subr.mxu1 %v1723_v11 }
  0x5f   : > { %1447 = vmatprep.subr.mxu0 %v1723_v11  ;;  %v294_v40 = vcombine.low %v286_v37, %v293_v38  ;;  %1459 = vmatpush3.msra.mxu1 %v1948_v8 }
  0x60   : > { %1466 = vmatprep.mubr.msk.f32.mxu1 %vm1725_vm1, %v1723_v11  ;;  %1433 = vmatprep.mubr.msk.f32.mxu0 %vm295_vm2, %v277_v39 }
  0x61   : > { %1460 = vmatprep.subr.mxu1 %v1723_v11  ;;  %1434 = vmatmul.mubr.msk.f32.vlgmr.msra.gmra.mxu0 %vm295_vm2, %v294_v40 }
  0x62   : > { %1461 = vmatpush3.msra.mxu1 %v1953_v12  ;;  %1448 = vmatpush3.msra.mxu0 %v1948_v8 }
  0x63   : > { %1455 = vmatprep.mubr.msk.f32.mxu0 %vm1725_vm1, %v1723_v11  ;;  %1449 = vmatprep.subr.mxu0 %v1723_v11 }
  0x64   : > { %1462 = vmatprep.subr.mxu1 %v1723_v11  ;;  %1450 = vmatpush3.msra.mxu0 %v1953_v12 }
  0x65   : > { %1463 = vmatpush3.msra.mxu1 %v1958_v14  ;;  %1451 = vmatprep.subr.mxu0 %v1723_v11 }
  0x66   : > { %1464 = vmatprep.subr.mxu1 %v1723_v11  ;;  %1452 = vmatpush3.msra.mxu0 %v1958_v14 }
  0x67   : > { %1465 = vmatpush3.msra.mxu1 %v1986_v29  ;;  %1453 = vmatprep.subr.mxu0 %v1723_v11 }
  0x68   : > { %1480 = vmatprep.subr.mxu1 %v1723_v11  ;;  %1454 = vmatpush3.msra.mxu0 %v1986_v29 }
  0x69   : > { %1469 = vmatprep.subr.mxu0 %v1723_v11 }
 0x11d   : > { %v498_v41 = vpop.f32.mrf.mxu1 }
 0x11e   : > { %510 = vrot.lane.b32.xlu0 %v498_v41, %s1726_s29 }
 0x11f   : > { %v1446_v42 = vpop.f32.mrf.mxu1 }
 0x121   : > { %v1435_v43 = vpop.f32.mrf.mxu0 }
 0x122   : > { %v394_v44 = vcombine.high %v1435_v43, %v1435_v43  ;;  %v401_v45 = vrot.slane %v1435_v43, %v268_v33 }
 0x123   : > { %v366_v46 = vpop.f32.mrf.mxu0 }
 0x124   : > { %v408_v47 = vrot.slane %v394_v44, %v268_v33  ;;  %v409_v48 = vcombine.high %v401_v45, %v401_v45  ;;  %424 = vst.msk [vmem:[#allocation2 + $0x8] sm:$0x3] %vm419_vm3, %v401_v45  ;;  %v377_v49 = vcombine.high %v366_v46, %v366_v46  ;;  %v384_v50 = vrot.slane %v366_v46, %v268_v33 }
 0x126   : > { %v410_v51 = vcombine.high %v408_v47, %v408_v47  ;;  %425 = vst.msk [vmem:[#allocation2 + $0xa] sm:$0x3] %vm419_vm3, %v409_v48  ;;  %426 = vst.msk [vmem:[#allocation2 + $0xc] sm:$0x3] %vm419_vm3, %v408_v47  ;;  %v391_v52 = vrot.slane %v377_v49, %v268_v33  ;;  %v392_v53 = vcombine.high %v384_v50, %v384_v50 }
 0x127   : > { %420 = vst.msk [vmem:[#allocation2] sm:$0x3] %vm419_vm3, %v384_v50 }
 0x128   : > { %427 = vst.msk [vmem:[#allocation2 + $0xe] sm:$0x3] %vm419_vm3, %v410_v51  ;;  %v393_v54 = vcombine.high %v391_v52, %v391_v52  ;;  %421 = vst.msk [vmem:[#allocation2 + $0x2] sm:$0x3] %vm419_vm3, %v392_v53 }
 0x129   : > { %422 = vst.msk [vmem:[#allocation2 + $0x4] sm:$0x3] %vm419_vm3, %v391_v52 }
 0x12a   : > { %423 = vst.msk [vmem:[#allocation2 + $0x6] sm:$0x3] %vm419_vm3, %v393_v54 }
 0x12e   : > { %v428_v55 = vld [vmem:[#allocation2] sm:$0x3] }
 0x12f   : > { %v502_v56 = vadd.f32 %v498_v41, %v428_v55  ;;  %v535_v13 = vld [vmem:[#allocation2 + $0x2] sm:$0x3] }
 0x130   : > { %v641_v34 = vld [vmem:[#allocation2 + $0x4] sm:$0x3] }
 0x131   : > { %v1353_v57 = vmul.f32 -1.442695, %v502_v56  ;;  %v747_v53 = vld [vmem:[#allocation2 + $0x6] sm:$0x3] }
 0x133   : > { %1575 = vpow2.f32 %v1353_v57 }
 0x140   : > { %v1576_v58 = vpop.eup %1575 }
 0x141   : > { %v506_v59 = vadd.f32 1.0, %v1576_v58 }
 0x143   : > { %1577 = vrcp.f32 %v506_v59 }
 0x150   : > { %v1578_v60 = vpop.eup %1577 }
 0x151   : > { %v520_v2 = vsub.f32 1.0, %v1578_v60  ;;  %v526_v4 = vmul.f32 0.0, %v1578_v60 }
 0x190   : > { %v511_v61 = vpop.permute.xlu0 %510 }
 0x191   : > { %v513_v62 = vmul.f32 %v1578_v60, %v511_v61 }
 0x193   : > { %515 = vrot.lane.b32.xlu0 %v513_v62, %s1726_s29 }
 0x205   : > { %v516_v63 = vpop.permute.xlu0 %515 }
 0x206   : > { %v518_v0 = vadd.f32 %v516_v63, %v428_v55 }
 0x208   : > { %1579 = vtanh.f32 %v518_v0 }
 0x215   : > { %v1580_v1 = vpop.eup %1579 }
 0x216   : > { %522 = vrot.lane.b32.xlu1 %v1580_v1, %s1727_s24 }
 0x288   : > { %v523_v3 = vpop.permute.xlu1 %522 }
 0x289   : > { %v525_v5 = vmul.f32 %v523_v3, %v520_v2 }
 0x28b   : > { %v527_v6 = vadd.f32 %v526_v4, %v525_v5 }
 0x28d   : > { %529 = vrot.lane.b32.xlu1 %v527_v6, %s1727_s24 }
 0x2ff   : > { %v530_v7 = vpop.permute.xlu1 %529 }
 0x300   : > { %533 = vst.msk [vmem:[%s2165_s3] sm:$0x3] %vm532_vm4, %v530_v7  ;;  %1456 = vmatmul.mubr.msk.f32.vlgmr.msra.gmra.mxu0 %vm295_vm2, %v530_v7 }
 0x301   : > { %1470 = vmatpush3.msra.mxu0 %v1948_v8  ;;  %1477 = vmatprep.mubr.msk.f32.mxu0 %vm1725_vm1, %v1723_v11 }
 0x302   : > { %1471 = vmatprep.subr.mxu0 %v1723_v11 }
 0x303   : > { %1472 = vmatpush3.msra.mxu0 %v1953_v12 }
 0x304   : > { %1473 = vmatprep.subr.mxu0 %v1723_v11 }
 0x305   : > { %1474 = vmatpush3.msra.mxu0 %v1958_v14 }
 0x306   : > { %1475 = vmatprep.subr.mxu0 %v1723_v11 }
 0x307   : > { %1476 = vmatpush3.msra.mxu0 %v1986_v29 }
 0x308   : > { %1491 = vmatprep.subr.mxu0 %v1723_v11 }
 0x3c0   : > { %v604_v9 = vpop.f32.mrf.mxu0 }
 0x3c1   : > { %616 = vrot.lane.b32.xlu0 %v604_v9, %s1726_s29  ;;  %v608_v15 = vadd.f32 %v604_v9, %v535_v13  ;;  %v853_v9 = vld [vmem:[#allocation2 + $0x8] sm:$0x3] }
 0x3c2   : > { %v1457_v10 = vpop.f32.mrf.mxu0 }
 0x3c3   : > { %v1355_v16 = vmul.f32 -1.442695, %v608_v15 }
 0x3c5   : > { %1581 = vpow2.f32 %v1355_v16 }
 0x3d2   : > { %v1582_v17 = vpop.eup %1581 }
 0x3d3   : > { %v612_v18 = vadd.f32 1.0, %v1582_v17 }
 0x3d5   : > { %1583 = vrcp.f32 %v612_v18 }
 0x3e2   : > { %v1584_v19 = vpop.eup %1583 }
 0x3e3   : > { %v626_v25 = vsub.f32 1.0, %v1584_v19  ;;  %v632_v27 = vmul.f32 %v1584_v19, %v527_v6 }
 0x433   : > { %v617_v20 = vpop.permute.xlu0 %616 }
 0x434   : > { %v619_v21 = vmul.f32 %v1584_v19, %v617_v20 }
 0x436   : > { %621 = vrot.lane.b32.xlu1 %v619_v21, %s1726_s29 }
 0x4a8   : > { %v622_v22 = vpop.permute.xlu1 %621 }
 0x4a9   : > { %v624_v23 = vadd.f32 %v622_v22, %v535_v13 }
 0x4ab   : > { %1585 = vtanh.f32 %v624_v23 }
 0x4b8   : > { %v1586_v24 = vpop.eup %1585 }
 0x4b9   : > { %628 = vrot.lane.b32.xlu0 %v1586_v24, %s1727_s24 }
 0x52b   : > { %v629_v26 = vpop.permute.xlu0 %628 }
 0x52c   : > { %v631_v28 = vmul.f32 %v629_v26, %v626_v25 }
 0x52e   : > { %v633_v30 = vadd.f32 %v632_v27, %v631_v28 }
 0x530   : > { %635 = vrot.lane.b32.xlu1 %v633_v30, %s1727_s24 }
 0x5a2   : > { %v636_v31 = vpop.permute.xlu1 %635 }
 0x5a3   : > { %1356 = vst.msk [vmem:[%s2165_s3 + $0x2] sm:$0x3] %vm532_vm4, %v636_v31  ;;  %1467 = vmatmul.mubr.msk.f32.vlgmr.msra.gmra.mxu1 %vm295_vm2, %v636_v31 }
 0x5a4   : > { %1481 = vmatpush3.msra.mxu1 %v1948_v8  ;;  %1488 = vmatprep.mubr.msk.f32.mxu1 %vm1725_vm1, %v1723_v11 }
 0x5a5   : > { %1482 = vmatprep.subr.mxu1 %v1723_v11 }
 0x5a6   : > { %1483 = vmatpush3.msra.mxu1 %v1953_v12 }
 0x5a7   : > { %1484 = vmatprep.subr.mxu1 %v1723_v11 }
 0x5a8   : > { %1485 = vmatpush3.msra.mxu1 %v1958_v14 }
 0x5a9   : > { %1486 = vmatprep.subr.mxu1 %v1723_v11 }
 0x5aa   : > { %1487 = vmatpush3.msra.mxu1 %v1986_v29 }
 0x5ab   : > { %1502 = vmatprep.subr.mxu1 %v1723_v11 }
 0x663   : > { %v710_v32 = vpop.f32.mrf.mxu1 }
 0x664   : > { %722 = vrot.lane.b32.xlu0 %v710_v32, %s1726_s29  ;;  %v714_v35 = vadd.f32 %v710_v32, %v641_v34 }
 0x665   : > { %v1468_v33 = vpop.f32.mrf.mxu1 }
 0x666   : > { %v1358_v36 = vmul.f32 -1.442695, %v714_v35 }
 0x668   : > { %1587 = vpow2.f32 %v1358_v36 }
 0x675   : > { %v1588_v37 = vpop.eup %1587 }
 0x676   : > { %v718_v38 = vadd.f32 1.0, %v1588_v37 }
 0x678   : > { %1589 = vrcp.f32 %v718_v38 }
 0x685   : > { %v1590_v39 = vpop.eup %1589 }
 0x686   : > { %v732_v45 = vsub.f32 1.0, %v1590_v39  ;;  %v738_v47 = vmul.f32 %v1590_v39, %v633_v30 }
 0x6d6   : > { %v723_v40 = vpop.permute.xlu0 %722 }
 0x6d7   : > { %v725_v41 = vmul.f32 %v1590_v39, %v723_v40 }
 0x6d9   : > { %727 = vrot.lane.b32.xlu1 %v725_v41, %s1726_s29 }
 0x74b   : > { %v728_v42 = vpop.permute.xlu1 %727 }
 0x74c   : > { %v730_v43 = vadd.f32 %v728_v42, %v641_v34 }
 0x74e   : > { %1591 = vtanh.f32 %v730_v43 }
 0x75b   : > { %v1592_v44 = vpop.eup %1591 }
 0x75c   : > { %734 = vrot.lane.b32.xlu0 %v1592_v44, %s1727_s24 }
 0x7ce   : > { %v735_v46 = vpop.permute.xlu0 %734 }
 0x7cf   : > { %v737_v48 = vmul.f32 %v735_v46, %v732_v45  ;;  %v1065_v46 = vld [vmem:[#allocation2 + $0xc] sm:$0x3] }
 0x7d1   : > { %v739_v49 = vadd.f32 %v738_v47, %v737_v48 }
 0x7d3   : > { %741 = vrot.lane.b32.xlu1 %v739_v49, %s1727_s24 }
 0x845   : > { %v742_v50 = vpop.permute.xlu1 %741 }
 0x846   : > { %1359 = vst.msk [vmem:[%s2165_s3 + $0x4] sm:$0x3] %vm532_vm4, %v742_v50  ;;  %1478 = vmatmul.mubr.msk.f32.vlgmr.msra.gmra.mxu0 %vm295_vm2, %v742_v50 }
 0x847   : > { %1492 = vmatpush3.msra.mxu0 %v1948_v8  ;;  %1499 = vmatprep.mubr.msk.f32.mxu0 %vm1725_vm1, %v1723_v11 }
 0x848   : > { %1493 = vmatprep.subr.mxu0 %v1723_v11 }
 0x849   : > { %1494 = vmatpush3.msra.mxu0 %v1953_v12 }
 0x84a   : > { %1495 = vmatprep.subr.mxu0 %v1723_v11 }
 0x84b   : > { %1496 = vmatpush3.msra.mxu0 %v1958_v14 }
 0x84c   : > { %1497 = vmatprep.subr.mxu0 %v1723_v11 }
 0x84d   : > { %1498 = vmatpush3.msra.mxu0 %v1986_v29 }
 0x84e   : > { %1513 = vmatprep.subr.mxu0 %v1723_v11 }
 0x906   : > { %v816_v51 = vpop.f32.mrf.mxu0 }
 0x907   : > { %828 = vrot.lane.b32.xlu0 %v816_v51, %s1726_s29  ;;  %v820_v54 = vadd.f32 %v816_v51, %v747_v53 }
 0x908   : > { %v1479_v52 = vpop.f32.mrf.mxu0 }
 0x909   : > { %v1361_v55 = vmul.f32 -1.442695, %v820_v54 }
 0x90b   : > { %1593 = vpow2.f32 %v1361_v55 }
 0x918   : > { %v1594_v56 = vpop.eup %1593 }
 0x919   : > { %v824_v57 = vadd.f32 1.0, %v1594_v56 }
 0x91b   : > { %1595 = vrcp.f32 %v824_v57 }
 0x928   : > { %v1596_v58 = vpop.eup %1595 }
 0x929   : > { %v838_v0 = vsub.f32 1.0, %v1596_v58  ;;  %v844_v2 = vmul.f32 %v1596_v58, %v739_v49 }
 0x979   : > { %v829_v59 = vpop.permute.xlu0 %828 }
 0x97a   : > { %v831_v60 = vmul.f32 %v1596_v58, %v829_v59 }
 0x97c   : > { %833 = vrot.lane.b32.xlu1 %v831_v60, %s1726_s29 }
 0x9ee   : > { %v834_v61 = vpop.permute.xlu1 %833 }
 0x9ef   : > { %v836_v62 = vadd.f32 %v834_v61, %v747_v53 }
 0x9f1   : > { %1597 = vtanh.f32 %v836_v62 }
 0x9fe   : > { %v1598_v63 = vpop.eup %1597 }
 0x9ff   : > { %840 = vrot.lane.b32.xlu0 %v1598_v63, %s1727_s24 }
 0xa71   : > { %v841_v1 = vpop.permute.xlu0 %840 }
 0xa72   : > { %v843_v3 = vmul.f32 %v841_v1, %v838_v0  ;;  %v1171_v1 = vld [vmem:[#allocation2 + $0xe] sm:$0x3] }
 0xa74   : > { %v845_v4 = vadd.f32 %v844_v2, %v843_v3 }
 0xa76   : > { %847 = vrot.lane.b32.xlu1 %v845_v4, %s1727_s24 }
 0xae8   : > { %v848_v5 = vpop.permute.xlu1 %847 }
 0xae9   : > { %1362 = vst.msk [vmem:[%s2165_s3 + $0x6] sm:$0x3] %vm532_vm4, %v848_v5  ;;  %1489 = vmatmul.mubr.msk.f32.vlgmr.msra.gmra.mxu1 %vm295_vm2, %v848_v5 }
 0xaea   : > { %1503 = vmatpush3.msra.mxu1 %v1948_v8  ;;  %1510 = vmatprep.mubr.msk.f32.mxu1 %vm1725_vm1, %v1723_v11 }
 0xaeb   : > { %1504 = vmatprep.subr.mxu1 %v1723_v11 }
 0xaec   : > { %1505 = vmatpush3.msra.mxu1 %v1953_v12 }
 0xaed   : > { %1506 = vmatprep.subr.mxu1 %v1723_v11 }
 0xaee   : > { %1507 = vmatpush3.msra.mxu1 %v1958_v14 }
 0xaef   : > { %1508 = vmatprep.subr.mxu1 %v1723_v11 }
 0xaf0   : > { %1509 = vmatpush3.msra.mxu1 %v1986_v29 }
 0xba9   : > { %v922_v6 = vpop.f32.mrf.mxu1 }
 0xbaa   : > { %934 = vrot.lane.b32.xlu0 %v922_v6, %s1726_s29  ;;  %v926_v10 = vadd.f32 %v922_v6, %v853_v9 }
 0xbab   : > { %v1490_v7 = vpop.f32.mrf.mxu1 }
 0xbac   : > { %v1364_v13 = vmul.f32 -1.442695, %v926_v10 }
 0xbae   : > { %1599 = vpow2.f32 %v1364_v13 }
 0xbbb   : > { %v1600_v15 = vpop.eup %1599 }
 0xbbc   : > { %v930_v16 = vadd.f32 1.0, %v1600_v15 }
 0xbbe   : > { %1601 = vrcp.f32 %v930_v16 }
 0xbcb   : > { %v1602_v17 = vpop.eup %1601 }
 0xbcc   : > { %v944_v23 = vsub.f32 1.0, %v1602_v17  ;;  %v950_v25 = vmul.f32 %v1602_v17, %v845_v4 }
 0xc1c   : > { %v935_v18 = vpop.permute.xlu0 %934 }
 0xc1d   : > { %v937_v19 = vmul.f32 %v1602_v17, %v935_v18 }
 0xc1f   : > { %939 = vrot.lane.b32.xlu1 %v937_v19, %s1726_s29 }
 0xc91   : > { %v940_v20 = vpop.permute.xlu1 %939 }
 0xc92   : > { %v942_v21 = vadd.f32 %v940_v20, %v853_v9 }
 0xc94   : > { %1603 = vtanh.f32 %v942_v21 }
 0xca1   : > { %v1604_v22 = vpop.eup %1603 }
 0xca2   : > { %946 = vrot.lane.b32.xlu0 %v1604_v22, %s1727_s24 }
 0xd14   : > { %v947_v24 = vpop.permute.xlu0 %946 }
 0xd15   : > { %v949_v26 = vmul.f32 %v947_v24, %v944_v23 }
 0xd17   : > { %v951_v27 = vadd.f32 %v950_v25, %v949_v26 }
 0xd19   : > { %953 = vrot.lane.b32.xlu1 %v951_v27, %s1727_s24 }
 0xd8b   : > { %v954_v28 = vpop.permute.xlu1 %953 }
 0xd8c   : > { %1365 = vst.msk [vmem:[%s2165_s3 + $0x8] sm:$0x3] %vm532_vm4, %v954_v28  ;;  %1500 = vmatmul.mubr.msk.f32.vlgmr.msra.gmra.mxu0 %vm295_vm2, %v954_v28 }
 0xd8d   : > { %1514 = vmatpush3.msra.mxu0 %v1948_v8  ;;  %1521 = vmatprep.mubr.msk.f32.mxu0 %vm1725_vm1, %v1723_v11  ;;  %v959_v8 = vld [vmem:[#allocation2 + $0xa] sm:$0x3] }
 0xd8e   : > { %1515 = vmatprep.subr.mxu0 %v1723_v11 }
 0xd8f   : > { %1516 = vmatpush3.msra.mxu0 %v1953_v12 }
 0xd90   : > { %1517 = vmatprep.subr.mxu0 %v1723_v11 }
 0xd91   : > { %1518 = vmatpush3.msra.mxu0 %v1958_v14 }
 0xd92   : > { %1519 = vmatprep.subr.mxu0 %v1723_v11 }
 0xd93   : > { %1520 = vmatpush3.msra.mxu0 %v1986_v29 }
 0xe4c   : > { %v1028_v30 = vpop.f32.mrf.mxu0 }
 0xe4d   : > { %1040 = vrot.lane.b32.xlu0 %v1028_v30, %s1726_s29  ;;  %v1032_v32 = vadd.f32 %v1028_v30, %v959_v8 }
 0xe4e   : > { %v1501_v31 = vpop.f32.mrf.mxu0 }
 0xe4f   : > { %v1367_v33 = vmul.f32 -1.442695, %v1032_v32 }
 0xe51   : > { %1605 = vpow2.f32 %v1367_v33 }
 0xe5e   : > { %v1606_v34 = vpop.eup %1605 }
 0xe5f   : > { %v1036_v35 = vadd.f32 1.0, %v1606_v34 }
 0xe61   : > { %1607 = vrcp.f32 %v1036_v35 }
 0xe6e   : > { %v1608_v12 = vpop.eup %1607 }
 0xe6f   : > { %v1050_v38 = vsub.f32 1.0, %v1608_v12  ;;  %v1056_v40 = vmul.f32 %v1608_v12, %v951_v27 }
 0xebf   : > { %v1041_v36 = vpop.permute.xlu0 %1040 }
 0xec0   : > { %v1043_v37 = vmul.f32 %v1608_v12, %v1041_v36 }
 0xec2   : > { %1045 = vrot.lane.b32.xlu1 %v1043_v37, %s1726_s29 }
 0xf34   : > { %v1046_v14 = vpop.permute.xlu1 %1045 }
 0xf35   : > { %v1048_v11 = vadd.f32 %v1046_v14, %v959_v8 }
 0xf37   : > { %1609 = vtanh.f32 %v1048_v11 }
 0xf44   : > { %v1610_v29 = vpop.eup %1609 }
 0xf45   : > { %1052 = vrot.lane.b32.xlu0 %v1610_v29, %s1727_s24 }
 0xfb7   : > { %v1053_v39 = vpop.permute.xlu0 %1052 }
 0xfb8   : > { %v1055_v41 = vmul.f32 %v1053_v39, %v1050_v38 }
 0xfba   : > { %v1057_v42 = vadd.f32 %v1056_v40, %v1055_v41 }
 0xfbc   : > { %1059 = vrot.lane.b32.xlu1 %v1057_v42, %s1727_s24 }
0x102e   : > { %v1060_v43 = vpop.permute.xlu1 %1059 }
0x102f   : > { %1368 = vst.msk [vmem:[%s2165_s3 + $0xa] sm:$0x3] %vm532_vm4, %v1060_v43  ;;  %1511 = vmatmul.mubr.msk.f32.vlgmr.msra.gmra.mxu1 %vm295_vm2, %v1060_v43 }
0x10ef   : > { %v1134_v44 = vpop.f32.mrf.mxu1 }
0x10f0   : > { %1146 = vrot.lane.b32.xlu0 %v1134_v44, %s1726_s29  ;;  %v1138_v47 = vadd.f32 %v1134_v44, %v1065_v46 }
0x10f1   : > { %v1512_v45 = vpop.f32.mrf.mxu1 }
0x10f2   : > { %v1370_v48 = vmul.f32 -1.442695, %v1138_v47 }
0x10f4   : > { %1611 = vpow2.f32 %v1370_v48 }
0x1101   : > { %v1612_v49 = vpop.eup %1611 }
0x1102   : > { %v1142_v50 = vadd.f32 1.0, %v1612_v49 }
0x1104   : > { %1613 = vrcp.f32 %v1142_v50 }
0x1111   : > { %v1614_v51 = vpop.eup %1613 }
0x1112   : > { %v1156_v57 = vsub.f32 1.0, %v1614_v51  ;;  %v1162_v59 = vmul.f32 %v1614_v51, %v1057_v42 }
0x1162   : > { %v1147_v52 = vpop.permute.xlu0 %1146 }
0x1163   : > { %v1149_v53 = vmul.f32 %v1614_v51, %v1147_v52 }
0x1165   : > { %1151 = vrot.lane.b32.xlu1 %v1149_v53, %s1726_s29 }
0x11d7   : > { %v1152_v54 = vpop.permute.xlu1 %1151 }
0x11d8   : > { %v1154_v55 = vadd.f32 %v1152_v54, %v1065_v46 }
0x11da   : > { %1615 = vtanh.f32 %v1154_v55 }
0x11e7   : > { %v1616_v56 = vpop.eup %1615 }
0x11e8   : > { %1158 = vrot.lane.b32.xlu0 %v1616_v56, %s1727_s24 }
0x125a   : > { %v1159_v58 = vpop.permute.xlu0 %1158 }
0x125b   : > { %v1161_v60 = vmul.f32 %v1159_v58, %v1156_v57 }
0x125d   : > { %v1163_v61 = vadd.f32 %v1162_v59, %v1161_v60 }
0x125f   : > { %1165 = vrot.lane.b32.xlu1 %v1163_v61, %s1727_s24 }
0x12d1   : > { %v1166_v62 = vpop.permute.xlu1 %1165 }
0x12d2   : > { %1371 = vst.msk [vmem:[%s2165_s3 + $0xc] sm:$0x3] %vm532_vm4, %v1166_v62  ;;  %1522 = vmatmul.mubr.msk.f32.vlgmr.msra.gmra.mxu0 %vm295_vm2, %v1166_v62 }
0x1392   : > { %v1240_v63 = vpop.f32.mrf.mxu0 }
0x1393   : > { %1252 = vrot.lane.b32.xlu0 %v1240_v63, %s1726_s29  ;;  %v1244_v2 = vadd.f32 %v1240_v63, %v1171_v1 }
0x1394   : > { %v1523_v0 = vpop.f32.mrf.mxu0 }
0x1395   : > { %v1373_v3 = vmul.f32 -1.442695, %v1244_v2 }
0x1397   : > { %1617 = vpow2.f32 %v1373_v3 }
0x13a4   : > { %v1618_v4 = vpop.eup %1617 }
0x13a5   : > { %v1248_v5 = vadd.f32 1.0, %v1618_v4 }
0x13a7   : > { %1619 = vrcp.f32 %v1248_v5 }
0x13b4   : > { %v1620_v6 = vpop.eup %1619 }
0x13b5   : > { %v1262_v16 = vsub.f32 1.0, %v1620_v6  ;;  %v1268_v18 = vmul.f32 %v1620_v6, %v1163_v61 }
0x1405   : > { %v1253_v7 = vpop.permute.xlu0 %1252 }
0x1406   : > { %v1255_v9 = vmul.f32 %v1620_v6, %v1253_v7 }
0x1408   : > { %1257 = vrot.lane.b32.xlu1 %v1255_v9, %s1726_s29 }
0x147a   : > { %v1258_v10 = vpop.permute.xlu1 %1257 }
0x147b   : > { %v1260_v13 = vadd.f32 %v1258_v10, %v1171_v1 }
0x147d   : > { %1621 = vtanh.f32 %v1260_v13 }
0x148a   : > { %v1622_v15 = vpop.eup %1621 }
0x148b   : > { %1264 = vrot.lane.b32.xlu0 %v1622_v15, %s1727_s24 }
0x14fd   : > { %v1265_v17 = vpop.permute.xlu0 %1264 }
0x14fe   : > { %v1267_v19 = vmul.f32 %v1265_v17, %v1262_v16 }
0x1500   : > { %v1269_v20 = vadd.f32 %v1268_v18, %v1267_v19 }
0x1502   : > { %1271 = vrot.lane.b32.xlu1 %v1269_v20, %s1727_s24 }
0x1574   : > { %v1272_v21 = vpop.permute.xlu1 %1271 }
0x1575   : > { %1374 = vst.msk [vmem:[%s2165_s3 + $0xe] sm:$0x3] %vm532_vm4, %v1272_v21 }
0x1576 PF: > { %p16_p11 = scmp.ge.s32.totalorder %s1768_s17, 4   ;;  %s2172_s12 = smov %s1709_s13 }
0x1577   : > { %s2173_s13 = smov %s1713_s14  ;;  %s2174_s14 = smov %s1778_s20 }
0x1578   : > { %s2175_s15 = smov %s1768_s17  ;;  %18 = sbr.rel (!%p16_p11) target bundleno = 5 (0x5), region = 99 }
0x157d   :  { %1287 = vsyncpa [#allocation4], 1 }
0x157e   :  { %1289 = vsyncpa [#allocation4 + $0x1], 1 }
0x157f   :  { %1290 = vsyncpa [#allocation6], 1 }
0x1580   :  { %1292 = vsyncpa [#allocation6 + $0x1], 1 }

</bundles_post_ra>
